<compile_context>
chip_gen: v6e
topology: v6e:2x2x1
jax: 0.10.0
libtpu: 0.0.40
codegen_flags: <defaults>
</compile_context>

<pallas_src>
import functools

import jax
import jax.numpy as jnp
from jax.experimental import pallas as pl
from jax.experimental.pallas import tpu as pltpu

LANE = 128
SUBLANE = 8


def _round_up(n, m):
    return ((n + m - 1) // m) * m


def _vmem_capacity_bytes():
    try:
        return int(pltpu.get_tpu_info().vmem_capacity_bytes)
    except Exception:
        return 64 << 20  # conservative fallback (v7x per-TensorCore VMEM)


def _fcd_kernel(x_ref, xa_ref, w1t_ref, w2t_ref, b_ref, o_ref):
    # x_ref/xa_ref: (TM, H) activation tiles
    # w1t_ref/w2t_ref: (H, Hp) resident bf16 weight halves (pre-transposed)
    # b_ref: (1, Hp) f32 bias
    xb = x_ref[...].astype(jnp.bfloat16)
    xab = xa_ref[...].astype(jnp.bfloat16)
    acc = jnp.dot(xb, w1t_ref[...], preferred_element_type=jnp.float32)
    acc = acc + jnp.dot(xab, w2t_ref[...], preferred_element_type=jnp.float32)
    acc = acc + b_ref[...]
    # sigmoid(z) = 0.5 * tanh(z/2) + 0.5 : one EUP transcendental, no divide,
    # numerically stable for any z.
    o_ref[...] = (jnp.tanh(acc * 0.5) * 0.5 + 0.5).astype(o_ref.dtype)


def prepare_fcd_params(weight, bias, *, param_dtype=jnp.bfloat16):
    """One-time parameter prep (call at init/load time, NOT per forward).

    Splits the (H, 2H) concat-input weight into its two halves, transposes
    them for row-major matmul, casts to bf16 for full-rate MXU, and pads the
    *output* dim to a lane multiple (no-op when H % 128 == 0).
    """
    H, two_h = weight.shape
    assert two_h == 2 * H, "FCD weight must be (H, 2H)"
    Hp = _round_up(H, LANE)
    w1t = weight[:, :H].T.astype(param_dtype)   # (H, H)
    w2t = weight[:, H:].T.astype(param_dtype)   # (H, H)
    b = bias.astype(jnp.float32)
    if Hp != H:
        w1t = jnp.pad(w1t, ((0, 0), (0, Hp - H)))
        w2t = jnp.pad(w2t, ((0, 0), (0, Hp - H)))
        b = jnp.pad(b, (0, Hp - H))
    return w1t, w2t, b.reshape(1, Hp)


def _choose_tiling(M, H, Hp, in_dtype, out_dtype, w_dtype):
    in_sz = jnp.dtype(in_dtype).itemsize
    out_sz = jnp.dtype(out_dtype).itemsize
    w_sz = jnp.dtype(w_dtype).itemsize

    vmem_cap = _vmem_capacity_bytes()
    ceiling = min(vmem_cap - (8 << 20), 100 << 20)  # leave Mosaic headroom
    slack = 4 << 20

    # Resident weights + bias (Pallas allocates 2 buffers even for constant
    # index_maps, though they are only DMA'd once).
    w_bytes = 2 * 2 * H * Hp * w_sz + 2 * Hp * 4
    # Double-buffered activation bytes per output row (x, xa inputs + output).
    row_bytes = 2 * (2 * H * in_sz + Hp * out_sz)

    tm_budget = (ceiling - slack - w_bytes) // row_bytes
    tm = int(min(2048, max(tm_budget, SUBLANE)))
    # >= 2 grid steps for small M so the "parallel" axis feeds both v7x TCs.
    tm = min(tm, _round_up(pl.cdiv(M, 2), SUBLANE))
    tm = max(SUBLANE, (tm // SUBLANE) * SUBLANE)
    if M <= SUBLANE:
        tm = M                          # full-extent block (legal for any M)
    tm = min(tm, _round_up(M, SUBLANE))

    est = w_bytes + tm * row_bytes + slack
    vmem_limit = int(min(max(est, 32 << 20), ceiling))
    return tm, vmem_limit


@functools.partial(jax.jit, static_argnames=("out_dtype",))
def fcd_forward(x, x_attend, w1t, w2t, b2, *, out_dtype=None):
    """x, x_attend: (B, S, H); w1t/w2t: (H, Hp) bf16; b2: (1, Hp) f32 -> (B, S, H)."""
    B, S, H = x.shape
    Hk, Hp = w1t.shape
    assert Hk == H, "weight input dim must match hidden size"
    M = B * S
    odt = jnp.dtype(x.dtype) if out_dtype is None else jnp.dtype(out_dtype)

    x2 = x.reshape(M, H)
    xa2 = x_attend.reshape(M, H)

    tm, vmem_limit = _choose_tiling(M, H, Hp, x.dtype, odt, w1t.dtype)
    grid = (pl.cdiv(M, tm),)

    cost = pl.CostEstimate(
        flops=2 * 2 * M * H * Hp,                    # two M x H x Hp matmuls
        transcendentals=M * Hp,                      # tanh (sigmoid)
        bytes_accessed=(2 * M * H * jnp.dtype(x.dtype).itemsize   # x, x_attend
                        + M * Hp * odt.itemsize                    # output
                        + 2 * H * Hp * jnp.dtype(w1t.dtype).itemsize
                        + Hp * 4),
    )

    out2 = pl.pallas_call(
        _fcd_kernel,
        out_shape=jax.ShapeDtypeStruct((M, Hp), odt),
        grid=grid,
        in_specs=[
            pl.BlockSpec((tm, H), lambda i: (i, 0)),
            pl.BlockSpec((tm, H), lambda i: (i, 0)),
            pl.BlockSpec((H, Hp), lambda i: (0, 0)),   # resident weight half 1
            pl.BlockSpec((H, Hp), lambda i: (0, 0)),   # resident weight half 2
            pl.BlockSpec((1, Hp), lambda i: (0, 0)),   # resident bias
        ],
        out_specs=pl.BlockSpec((tm, Hp), lambda i: (i, 0)),
        compiler_params=pltpu.CompilerParams(
            dimension_semantics=("parallel",),          # megacore split (v7x)
            vmem_limit_bytes=vmem_limit,
        ),
        cost_estimate=cost,
    )(x2, xa2, w1t, w2t, b2)

    out2 = out2 if Hp == H else out2[:, :H]
    return out2.reshape(B, S, H)


def init_fcd_params(key, hidden_size, dtype=jnp.float32):
    """Deterministic init mimicking nn.Linear defaults (uniform +/- 1/sqrt(fan_in))."""
    k_w, k_b = jax.random.split(key)
    fan_in = hidden_size * 2
    bound = 1.0 / (fan_in ** 0.5)
    weight = jax.random.uniform(k_w, (hidden_size, fan_in), dtype,
                                minval=-bound, maxval=bound)
    bias = jax.random.uniform(k_b, (hidden_size,), dtype,
                              minval=-bound, maxval=bound)
    return weight, bias


if __name__ == "__main__":
    B, S, H = 2, 8, 32

    key = jax.random.PRNGKey(0)
    k_x, k_xa, k_p = jax.random.split(key, 3)

    x = jax.random.normal(k_x, (B, S, H), jnp.float32)
    x_attend = jax.random.normal(k_xa, (B, S, H), jnp.float32)
    weight, bias = init_fcd_params(k_p, H)

    # One-time param prep (split / transpose / bf16 cast / lane pad).
    w1t, w2t, b2 = prepare_fcd_params(weight, bias)

    out = fcd_forward(x, x_attend, w1t, w2t, b2)
    out = jax.block_until_ready(out)

    # Pure-JAX f32 reference of the same semantics.
    ref = jax.nn.sigmoid(
        jnp.concatenate([x, x_attend], axis=-1) @ weight.T + bias)
    assert out.shape == (B, S, H)
    assert out.dtype == x.dtype
    # bf16 MXU operands (f32 accumulation) -> small drift vs the f32 reference.
    assert jnp.allclose(out, ref, atol=2e-2, rtol=2e-2), \
        float(jnp.max(jnp.abs(out - ref)))

    print("KERNEL_OK")
</pallas_src>

<mosaic_0001>
module attributes {stable_mosaic.version = 11 : i64} {
  func.func @_fcd_kernel(%arg0: i32, %arg1: memref<8x32xf32, #tpu.memory_space<vmem>>, %arg2: memref<8x32xf32, #tpu.memory_space<vmem>>, %arg3: memref<32x128xbf16, #tpu.memory_space<vmem>>, %arg4: memref<32x128xbf16, #tpu.memory_space<vmem>>, %arg5: memref<1x128xf32, #tpu.memory_space<vmem>>, %arg6: memref<8x128xf32, #tpu.memory_space<vmem>>) attributes {dimension_semantics = [#tpu.dimension_semantics<parallel>], iteration_bounds = array<i64: 2>, scalar_prefetch = 0 : i64, scratch_operands = 0 : i64, tpu.core_type = #tpu.core_type<tc>, window_params = [{transform_indices = @transform_0, window_bounds = array<i64: 8, 32>}, {transform_indices = @transform_1, window_bounds = array<i64: 8, 32>}, {pipeline_mode = #tpu.pipeline_mode<synchronous>, transform_indices = @transform_2, window_bounds = array<i64: 32, 128>}, {pipeline_mode = #tpu.pipeline_mode<synchronous>, transform_indices = @transform_3, window_bounds = array<i64: 32, 128>}, {pipeline_mode = #tpu.pipeline_mode<synchronous>, transform_indices = @transform_4, window_bounds = array<i64: 1, 128>}, {transform_indices = @transform_5, window_bounds = array<i64: 8, 128>}]} {
    %c0 = arith.constant 0 : index
    %c0_0 = arith.constant 0 : index
    %0 = vector.load %arg1[%c0, %c0_0] : memref<8x32xf32, #tpu.memory_space<vmem>>, vector<8x32xf32>
    %1 = arith.truncf %0 : vector<8x32xf32> to vector<8x32xbf16>
    %c0_1 = arith.constant 0 : index
    %c0_2 = arith.constant 0 : index
    %2 = vector.load %arg2[%c0_1, %c0_2] : memref<8x32xf32, #tpu.memory_space<vmem>>, vector<8x32xf32>
    %3 = arith.truncf %2 : vector<8x32xf32> to vector<8x32xbf16>
    %c0_3 = arith.constant 0 : index
    %c0_4 = arith.constant 0 : index
    %4 = vector.load %arg3[%c0_3, %c0_4] : memref<32x128xbf16, #tpu.memory_space<vmem>>, vector<32x128xbf16>
    %cst = arith.constant dense<0.000000e+00> : vector<8x128xf32>
    %5 = tpu.matmul %1, %4, %cst {dimension_numbers = #tpu.dot_dimension_numbers<[1], [0], [0], [1], [0, 0, 1, 1], [], []>} : vector<8x32xbf16>, vector<32x128xbf16>, vector<8x128xf32> -> vector<8x128xf32>
    %c0_5 = arith.constant 0 : index
    %c0_6 = arith.constant 0 : index
    %6 = vector.load %arg4[%c0_5, %c0_6] : memref<32x128xbf16, #tpu.memory_space<vmem>>, vector<32x128xbf16>
    %cst_7 = arith.constant dense<0.000000e+00> : vector<8x128xf32>
    %7 = tpu.matmul %3, %6, %cst_7 {dimension_numbers = #tpu.dot_dimension_numbers<[1], [0], [0], [1], [0, 0, 1, 1], [], []>} : vector<8x32xbf16>, vector<32x128xbf16>, vector<8x128xf32> -> vector<8x128xf32>
    %8 = arith.addf %5, %7 : vector<8x128xf32>
    %c0_8 = arith.constant 0 : index
    %c0_9 = arith.constant 0 : index
    %9 = vector.load %arg5[%c0_8, %c0_9] : memref<1x128xf32, #tpu.memory_space<vmem>>, vector<1x128xf32>
    %10 = vector.broadcast %9 : vector<1x128xf32> to vector<8x128xf32>
    %11 = arith.addf %8, %10 : vector<8x128xf32>
    %cst_10 = arith.constant 5.000000e-01 : f32
    %12 = vector.broadcast %cst_10 : f32 to vector<8x128xf32>
    %13 = arith.mulf %11, %12 : vector<8x128xf32>
    %14 = math.tanh %13 : vector<8x128xf32>
    %cst_11 = arith.constant 5.000000e-01 : f32
    %15 = vector.broadcast %cst_11 : f32 to vector<8x128xf32>
    %16 = arith.mulf %14, %15 : vector<8x128xf32>
    %cst_12 = arith.constant 5.000000e-01 : f32
    %17 = vector.broadcast %cst_12 : f32 to vector<8x128xf32>
    %18 = arith.addf %16, %17 : vector<8x128xf32>
    %c0_13 = arith.constant 0 : index
    %c0_14 = arith.constant 0 : index
    %19 = vector.load %arg6[%c0_13, %c0_14] : memref<8x128xf32, #tpu.memory_space<vmem>>, vector<8x128xf32>
    tpu.vector_store %arg6[%c0_13, %c0_14], %18 {strides = array<i32>} : memref<8x128xf32, #tpu.memory_space<vmem>>, vector<8x128xf32>,
    return
  }
  func.func @transform_0(%arg0: i32) -> (i32, i32) {
    %c0_i32 = arith.constant 0 : i32
    %c0_i32_0 = arith.constant 0 : i32
    return %arg0, %c0_i32 : i32, i32
  }
  func.func @transform_1(%arg0: i32) -> (i32, i32) {
    %c0_i32 = arith.constant 0 : i32
    %c0_i32_0 = arith.constant 0 : i32
    return %arg0, %c0_i32 : i32, i32
  }
  func.func @transform_2(%arg0: i32) -> (i32, i32) {
    %c0_i32 = arith.constant 0 : i32
    %c0_i32_0 = arith.constant 0 : i32
    %c0_i32_1 = arith.constant 0 : i32
    return %c0_i32, %c0_i32_0 : i32, i32
  }
  func.func @transform_3(%arg0: i32) -> (i32, i32) {
    %c0_i32 = arith.constant 0 : i32
    %c0_i32_0 = arith.constant 0 : i32
    %c0_i32_1 = arith.constant 0 : i32
    return %c0_i32, %c0_i32_0 : i32, i32
  }
  func.func @transform_4(%arg0: i32) -> (i32, i32) {
    %c0_i32 = arith.constant 0 : i32
    %c0_i32_0 = arith.constant 0 : i32
    %c0_i32_1 = arith.constant 0 : i32
    return %c0_i32, %c0_i32_0 : i32, i32
  }
  func.func @transform_5(%arg0: i32) -> (i32, i32) {
    %c0_i32 = arith.constant 0 : i32
    %c0_i32_0 = arith.constant 0 : i32
    return %arg0, %c0_i32 : i32, i32
  }
}

</mosaic_0001>

<bundles_post_ra>
// kernel: fcd_forward.1
= control target key start
LH: loop header
LB: loop body
LE: loop exit
PB: predicated region body
PF: predicated region fallthrough
CT: control target
= control target key end

     0   :  { %10 = vsyncpa [#allocation3], 0  ;;  %s1043_s0 = inlined_call_operand.hbm [shape: f32[16,32], index: 0, kind: input, shape index: {}]   ;;  %s1044_s1 = inlined_call_operand.hbm [shape: f32[16,32], index: 1, kind: input, shape index: {}]   ;;  %s1045_s2 = inlined_call_operand.hbm [shape: bf16[32,128], index: 2, kind: input, shape index: {}]   ;;  %s1046_s3 = inlined_call_operand.hbm [shape: bf16[32,128], index: 3, kind: input, shape index: {}]   ;;  %s1047_s4 = inlined_call_operand.vmem [shape: f32[1,128], index: 4, kind: input, shape index: {}]   ;;  %s1048_s5 = inlined_call_operand.vmem [shape: f32[16,128], index: 5, kind: output, shape index: {}]  }
   0x1   :  { %12 = vsyncpa [#allocation3 + $0x1], 0 }
   0x2   :  { %13 = vsyncpa [#allocation5], 0 }
   0x3   :  { %15 = vsyncpa [#allocation5 + $0x1], 0 }
   0x4   :  { %16 = vsyncpa [#allocation8], 0  ;;  %s865_s18 = smov 0   ;;  %s867_s19 = smov 0  }
   0x5   :  { %s869_s20 = smov 0   ;;  %s871_s21 = smov 0  }
   0x6 LB: > { %s884_s22 = sadd.s32 4294967295, %s825_s21   ;;  %p42_p0 = scmp.ne.s32.totalorder %s817_s19, %s813_s18  ;;  %s825_s21 = sphi %s871_s21, %s1065_s21   ;;  %s821_s20 = sphi %s869_s20, %s1064_s20   ;;  %s817_s19 = sphi %s867_s19, %s1063_s19   ;;  %s813_s18 = sphi %s865_s18, %s1062_s18  }
   0x7   : > { %p1049_p1 = scmp.eq.s32.totalorder %s884_s22, 0  ;;  %p551_p2 = scmp.ge.s32.totalorder %s825_s21, 1 }
   0x8   : > { %p168_p3 = scmp.lt.s32.totalorder %s825_s21, 3  ;;  %s827_s25 = smov [#allocation6]  }
   0x9   : > { %p892_p4 = por %p1049_p1, %p42_p0  ;;  %s180_s26 = sshll.u32 %s827_s25, 4  ;;  %s181_s26 = int_to_ptr.vmem [resolvable:$true] %s180_s26 }
   0xa   : > { %p896_p5 = pnand %p551_p2, %p168_p3  ;;  %s828_s28 = smov [#allocation7]  }
   0xb   : > { %s1052_s23 = scalar_select %p892_p4, 1, 0 }
   0xc   : > { %s1053_s24 = scalar_select %p896_p5, 1, 0 }
   0xd   : > { %p608_p6 = pneg %p896_p5  ;;  %s193_s29 = sshll.u32 %s828_s28, 4  ;;  %s194_s29 = int_to_ptr.vmem [resolvable:$true] %s193_s29 }
   0xe   : > { %s682_s30 = scalar_lea.vmem %s181_s26, 256  ;;  %p690_p12 = scmp.lt.s32.totalorder %s181_s26, %s181_s26 }
   0xf   : > { %p904_p7 = pnand %p608_p6, %p1049_p1  ;;  %p683_p9 = scmp.ne.s32.totalorder %s181_s26, %s682_s30 }
  0x10   : > { %p691_p13 = scmp.lt.s32.totalorder %s682_s30, %s682_s30 }
  0x11   : > { %p673_p8 = pneg %p904_p7 }
  0x12   : > { %p692_p0 = por %p691_p13, %p690_p12 }
  0x13   : > { %p685_p10 = pnand %p683_p9, %p673_p8 }
  0x15   : > { %p686_p11 = pneg %p685_p10 }
  0x17   : > { %p693_p2 = pnand %p692_p0, %p686_p11 }
  0x19   : > { %696 = shalt.err (!%p693_p2)
}
  0x1a   : > { %s829_s6 = smov 64   ;;  %s830_s7 = smov 4  }
  0x1b   : > { %611 = dma.hbm_to_vmem [thread:$0]  (!%p904_p7), %s1045_s2, 256, %s181_s26, [#allocation5], %s829_s6, %s829_s6, %s830_s7  }
  0x1c   : > { %s708_s10 = scalar_lea.vmem %s194_s29, 256  ;;  %p716_p10 = scmp.lt.s32.totalorder %s194_s29, %s194_s29 }
  0x1d   : > { %p709_p3 = scmp.ne.s32.totalorder %s194_s29, %s708_s10  ;;  %p717_p1 = scmp.lt.s32.totalorder %s708_s10, %s708_s10 }
  0x1f   : > { %p711_p6 = pnand %p709_p3, %p673_p8  ;;  %p718_p12 = por %p717_p1, %p716_p10 }
  0x21   : > { %p712_p9 = pneg %p711_p6 }
  0x23   : > { %p719_p11 = pnand %p718_p12, %p712_p9 }
  0x25   : > { %722 = shalt.err (!%p719_p11)
}
  0x26   : > { %614 = dma.hbm_to_vmem [thread:$0]  (!%p904_p7), %s1046_s3, 256, %s194_s29, [#allocation8], %s829_s6, %s829_s6, %s830_s7  }
  0x27   : > { %s927_s13 = sadd.s32 1, %s825_s21   ;;  %s29_s14 = sadd.s32 1, %s821_s20 }
  0x28   : > { %s26_s15 = ssub.s32 %s825_s21, %s927_s13  ;;  %p36_p1 = scmp.ne.s32.totalorder %s821_s20, %s817_s19 }
  0x29   : > { %p27_p8 = scmp.eq.s32.totalorder %s26_s15, 0  ;;  %p37_p13 = scmp.eq.s32.totalorder %s825_s21, 0 }
  0x2a   : > { %p624_p0 = scmp.lt.s32.totalorder %s825_s21, 2  ;;  %s210_s16 = sand.u32 1, %s821_s20  }
  0x2b   : > { %s938_s17 = scalar_select %p27_p8, %s821_s20, %s29_s14  }
  0x2c   : > { %p38_p2 = por %p37_p13, %p36_p1  ;;  %s940_s18 = sshll.u32 %s210_s16, 3 }
  0x2d   : > { %s556_s25 = sshll.u32 %s825_s21, 7  ;;  %s214_s29 = scalar_lea.vmem [#allocation2], %s940_s18 }
  0x2e   : > { %s946_s28 = scalar_lea.hbm %s1043_s0, %s556_s25  ;;  %s221_s30 = sshll.u32 %s214_s29, 4  ;;  %s222_s30 = int_to_ptr.vmem [resolvable:$true] %s221_s30 }
  0x2f   : > { %p949_p7 = pnand %p624_p0, %p38_p2  ;;  %s956_s9 = scalar_lea.hbm %s1044_s1, %s556_s25 }
  0x30   : > { %s211_s10 = scalar_lea.sflag [#allocation3], %s210_s16  ;;  %s723_s11 = scalar_lea.hbm %s946_s28, 128 }
  0x31   : > { %p724_p3 = scmp.ne.s32.totalorder %s946_s28, %s723_s11  ;;  %p725_p6 = pneg %p949_p7 }
  0x32   : > { %s728_s15 = scalar_lea.hbm %s1043_s0, 256  ;;  %p729_p12 = scmp.lt.s32.totalorder %s946_s28, %s1043_s0 }
  0x33   : > { %p726_p9 = pnand %p725_p6, %p724_p3  ;;  %p730_p11 = scmp.lt.s32.totalorder %s728_s15, %s723_s11 }
  0x35   : > { %p727_p10 = pneg %p726_p9  ;;  %p731_p1 = por %p730_p11, %p729_p12 }
  0x37   : > { %p732_p8 = pnand %p731_p1, %p727_p10 }
  0x39   : > { %735 = shalt.err (!%p732_p8)
}
  0x3a   : > { %s736_s16 = scalar_lea.vmem %s222_s30, 128  ;;  %s831_s25 = smov [#allocation2]  }
  0x3b   : > { %p737_p13 = scmp.ne.s32.totalorder %s222_s30, %s736_s16  ;;  %s741_s29 = sshll.u32 %s831_s25, 4  ;;  %s742_s29 = int_to_ptr.vmem [resolvable:$false] %s741_s29 }
  0x3c   : > { %s743_s7 = scalar_lea.vmem %s742_s29, 256  ;;  %p744_p3 = scmp.lt.s32.totalorder %s222_s30, %s742_s29 }
  0x3d   : > { %p739_p0 = pnand %p737_p13, %p725_p6  ;;  %p745_p9 = scmp.lt.s32.totalorder %s743_s7, %s736_s16 }
  0x3f   : > { %p740_p2 = pneg %p739_p0  ;;  %p746_p4 = por %p745_p9, %p744_p3 }
  0x41   : > { %p747_p5 = pnand %p746_p4, %p740_p2 }
  0x43   : > { %750 = shalt.err (!%p747_p5)
}
  0x44   : > { %618 = dma.hbm_to_vmem [thread:$0]  (!%p949_p7), %s946_s28, 128, %s222_s30, %s211_s10  }
  0x45   : > { %s228_s8 = sand.u32 1, %s825_s21   ;;  %s232_s11 = scalar_lea.vmem [#allocation4], %s940_s18 }
  0x46   : > { %s239_s12 = sshll.u32 %s232_s11, 4  ;;  %s229_s14 = scalar_lea.sflag [#allocation5], %s228_s8  ;;  %s240_s12 = int_to_ptr.vmem [resolvable:$true] %s239_s12 }
  0x47   : > { %s751_s15 = scalar_lea.hbm %s956_s9, 128  ;;  %s756_s16 = scalar_lea.hbm %s1044_s1, 256 }
  0x48   : > { %p752_p10 = scmp.ne.s32.totalorder %s956_s9, %s751_s15  ;;  %p757_p12 = scmp.lt.s32.totalorder %s956_s9, %s1044_s1 }
  0x49   : > { %p758_p11 = scmp.lt.s32.totalorder %s756_s16, %s751_s15 }
  0x4a   : > { %p754_p4 = pnand %p752_p10, %p725_p6 }
  0x4b   : > { %p759_p1 = por %p758_p11, %p757_p12 }
  0x4c   : > { %p755_p5 = pneg %p754_p4 }
  0x4e   : > { %p760_p8 = pnand %p759_p1, %p755_p5 }
  0x50   : > { %763 = shalt.err (!%p760_p8)
}
  0x51   : > { %s764_s21 = scalar_lea.vmem %s240_s12, 128  ;;  %s832_s18 = smov [#allocation4]  }
  0x52   : > { %p765_p13 = scmp.ne.s32.totalorder %s240_s12, %s764_s21  ;;  %s769_s28 = sshll.u32 %s832_s18, 4  ;;  %s770_s28 = int_to_ptr.vmem [resolvable:$false] %s769_s28 }
  0x53   : > { %s771_s30 = scalar_lea.vmem %s770_s28, 256  ;;  %p772_p3 = scmp.lt.s32.totalorder %s240_s12, %s770_s28 }
  0x54   : > { %p767_p0 = pnand %p765_p13, %p725_p6  ;;  %p773_p9 = scmp.lt.s32.totalorder %s771_s30, %s764_s21 }
  0x56   : > { %p768_p2 = pneg %p767_p0  ;;  %p774_p10 = por %p773_p9, %p772_p3 }
  0x58   : > { %p775_p4 = pnand %p774_p10, %p768_p2 }
  0x5a   : > { %778 = shalt.err (!%p775_p4)
}
  0x5b   : > { %621 = dma.hbm_to_vmem [thread:$0]  (!%p949_p7), %s956_s9, 128, %s240_s12, %s229_s14  }
  0x5c   : > { %p1056_p5 = scmp.ne.s32.totalorder %s1053_s24, 0 }
  0x5d   : > { %s250_s10 = sand.u32 (!%p1056_p5), 1, %s817_s19   ;;  %p1057_p6 = scmp.ne.s32.totalorder (!%p1056_p5), %s1052_s23, 0 }
  0x5e   : > { %248 = sbr.rel (%p1056_p5) target bundleno = 337 (0x151), region = 40  ;;  %s1001_s7 = sshll.u32 (!%p1056_p5), %s250_s10, 3 }
  0x5f   : > { %s251_s8 = scalar_lea.sflag (!%p1056_p5), [#allocation3], %s250_s10  ;;  %s254_s11 = scalar_lea.vmem (!%p1056_p5), [#allocation2], %s1001_s7 }
  0x63   : > { %796 = dma.done.wait (%p1057_p6), %s251_s8, 128  }
  0x64   : > { %798 = vsyncadd (%p1057_p6), %s251_s8, 4294967168  ;;  %s259_s6 = sand.u32 1, %s884_s22   ;;  %s263_s24 = scalar_lea.vmem [#allocation4], %s1001_s7 }
  0x65   : > { %s260_s9 = scalar_lea.sflag [#allocation5], %s259_s6 }
  0x66   : > { %800 = dma.done.wait (%p1057_p6), %s260_s9, 128  }
  0x67   : > { %802 = vsyncadd (%p1057_p6), %s260_s9, 4294967168  ;;  %p1058_p7 = scmp.eq.s32.totalorder %s884_s22, 0 }
  0x69   : > { %804 = dma.done.wait (%p1058_p7), [#allocation5], 256   ;;  %p1059_p12 = pmov %p1058_p7 }
  0x6a   : > { %p1060_p11 = pmov %p1058_p7 }
  0x6b   : > { %806 = vsyncadd (%p1059_p12), [#allocation5], 4294967040 }
  0x6c   : > { %808 = dma.done.wait (%p1060_p11), [#allocation8], 256   ;;  %p1061_p1 = pmov %p1058_p7 }
  0x6d   : > { %v833_v0 = vmov 0.0   ;;  %vm834_vm0 = vmmov 0   ;;  %v665_v1 = vld [vmem:[#allocation7 + $0x8] sm:$0xff]   ;;  %v666_v2 = vld [vmem:[#allocation6 + $0x8] sm:$0xff]   ;;  %v667_v3 = vld [vmem:[#allocation7] sm:$0xff]   ;;  %vm331_vm1 = vcmask 261120  }
  0x6e   : > { %810 = vsyncadd (%p1061_p1), [#allocation8], 4294967040  ;;  %580 = vmatprep.subr.bf16.mxu0 %v833_v0  ;;  %588 = vmatprep.subr.bf16.mxu1 %v833_v0  ;;  %v668_v4 = vld [vmem:[#allocation6] sm:$0xff]   ;;  %v309_v5 = vld [vmem:[%s263_s24] sm:$0xff]  ;;  %p302_p8 = scmp.lt.s32.totalorder %s884_s22, 1 }
  0x6f   : > { %584 = vmatprep.mubr.msk.bf16.mxu0 %vm834_vm0, %v833_v0  ;;  %592 = vmatprep.mubr.msk.bf16.mxu1 %vm834_vm0, %v833_v0  ;;  %v307_v6 = vld [vmem:[%s254_s11] sm:$0xff]  ;;  %v310_v7 = vpack.c.bf16 %v309_v5, %v309_v5 }
  0x70   : > { %581 = vmatpush3.bf16.msra.mxu0 %v665_v1  ;;  %589 = vmatpush3.bf16.msra.mxu1 %v666_v2  ;;  %v308_v8 = vpack.c.bf16 %v307_v6, %v307_v6  ;;  %v571_v11 = vld [vmem:[%s1047_s4] ss:$0 sm:$0xff]  ;;  %s1067_s22 = smov (!%p302_p8, %s884_s22), 1 }
  0x71   : > { %582 = vmatprep.subr.bf16.mxu0 %v833_v0  ;;  %590 = vmatprep.subr.bf16.mxu1 %v833_v0  ;;  %s564_s14 = sshll.u32 %s1067_s22, 3 }
  0x72   : > { %s305_s27 = scalar_lea.vmem %s1048_s5, %s564_s14 }
  0x74   : > { %583 = vmatpush3.bf16.msra.mxu0 %v667_v3  ;;  %591 = vmatpush3.bf16.msra.mxu1 %v668_v4 }
  0x77   : > { %585 = vmatmul.mubr.msk.bf16.vlgmr.msra.gmra.mxu0 %vm331_vm1, %v310_v7  ;;  %593 = vmatmul.mubr.msk.bf16.vlgmr.msra.gmra.mxu1 %vm331_vm1, %v308_v8 }
 0x137   : > { %v369_v9 = vpop.f32.mrf.mxu0  ;;  %v424_v10 = vpop.f32.mrf.mxu1 }
 0x138   : > { %v425_v12 = vadd.f32 %v424_v10, %v369_v9 }
 0x139   : > { %v586_v13 = vpop.f32.mrf.mxu0  ;;  %v594_v14 = vpop.f32.mrf.mxu1 }
 0x13a   : > { %v437_v15 = vadd.f32 %v571_v11, %v425_v12 }
 0x13b   : > { %v372_v16 = vpop.f32.mrf.mxu0  ;;  %v427_v17 = vpop.f32.mrf.mxu1 }
 0x13c   : > { %v438_v18 = vmul.f32 0.5, %v437_v15 }
 0x13d   : > { %v587_v19 = vpop.f32.mrf.mxu0  ;;  %v595_v20 = vpop.f32.mrf.mxu1 }
 0x13e   : > { %669 = vtanh.f32 %v438_v18 }
 0x14b   : > { %v670_v21 = vpop.eup %669 }
 0x14c   : > { %v440_v22 = vmul.f32 0.5, %v670_v21 }
 0x14e   : > { %v441_v23 = vadd.f32 0.5, %v440_v22 }
 0x150   : > { %442 = vst [vmem:[%s305_s27] sm:$0xff] %v441_v23 }
 0x151 PF: > { %p19_p13 = scmp.ge.s32.totalorder %s927_s13, 4   ;;  %s1062_s18 = smov %s817_s19 }
 0x152   : > { %s1063_s19 = smov %s821_s20  ;;  %s1064_s20 = smov %s938_s17 }
 0x153   : > { %s1065_s21 = smov %s927_s13  ;;  %21 = sbr.rel (!%p19_p13) target bundleno = 6 (0x6), region = 101 }
 0x158   :  { %462 = vsyncpa [#allocation3], 1 }
 0x159   :  { %464 = vsyncpa [#allocation3 + $0x1], 1 }
 0x15a   :  { %465 = vsyncpa [#allocation5], 1 }
 0x15b   :  { %467 = vsyncpa [#allocation5 + $0x1], 1 }
 0x15c   :  { %468 = vsyncpa [#allocation8], 1 }

</bundles_post_ra>
